<compile_context>
chip_gen: v7x
topology: tpu7x:2x2x1
jax: 0.10.0
libtpu: 0.0.40
codegen_flags: <defaults>
</compile_context>

<pallas_src>
import functools

import jax
import jax.numpy as jnp
import numpy as np
from jax.experimental import pallas as pl
from jax.experimental.pallas import tpu as pltpu

BN_EPS = 1e-5
NEG_SLOPE = 0.2
LANES = 128


def _conv_acc(xa_ref, xb_ref, w_ref):
    """Shared 4-tap conv for one tile.

    xa_ref/xb_ref: (1, L, 4*Cin) bf16, L = tile_h * Ws.  Flattened row
      r = h*Ws + w of the space-to-depth input; xb is shifted down by one
      input super-row (the bh=1 taps).
    w_ref: (4, 4*Cin, Coutp) bf16 weight taps [(bh,bw) = 00, 01, 10, 11].
    Returns (L, Coutp) f32.  Column w == Ws-1 of every row group is garbage
    (dropped by the wrapper / masked from the stats).
    """
    xa = xa_ref[0]                                   # (L, 4*Cin) bf16
    xb = xb_ref[0]
    a00 = jnp.dot(xa, w_ref[0], preferred_element_type=jnp.float32)
    a01 = jnp.dot(xa, w_ref[1], preferred_element_type=jnp.float32)
    a10 = jnp.dot(xb, w_ref[2], preferred_element_type=jnp.float32)
    a11 = jnp.dot(xb, w_ref[3], preferred_element_type=jnp.float32)
    # The bw=1 taps contribute from the *next* flattened row: out[r] += p[r+1].
    p = a01 + a11
    shifted = jnp.concatenate([p[1:], jnp.zeros_like(p[0:1])], axis=0)
    return a00 + a10 + shifted                       # (L, Coutp) f32


def _conv_stats_kernel(xa_ref, xb_ref, w_ref, s_ref, ss_ref, *, ws):
    """Pass 1: conv matmuls + per-tile BatchNorm partial sum / sum-of-squares."""
    acc = _conv_acc(xa_ref, xb_ref, w_ref)
    # Exclude the garbage column (w == ws - 1) from the statistics.
    row = jax.lax.broadcasted_iota(jnp.int32, acc.shape, 0)
    valid = (row % ws) != (ws - 1)
    av = jnp.where(valid, acc, 0.0)
    s_ref[0, 0] = jnp.sum(av, axis=0, keepdims=True)
    ss_ref[0, 0] = jnp.sum(av * av, axis=0, keepdims=True)


def _conv_bn_lrelu_kernel(xa_ref, xb_ref, w_ref, scale_ref, shift_ref, o_ref):
    """Pass 2: recompute conv, apply y*scale + shift, then LeakyReLU(0.2)."""
    acc = _conv_acc(xa_ref, xb_ref, w_ref)
    z = acc * scale_ref[...] + shift_ref[...]
    o_ref[0] = jnp.where(z >= 0, z, NEG_SLOPE * z)


def _pick_tile_h(ho, ws, target_rows=1024):
    """Largest divisor d of `ho` with d*ws <= target rows and a layout-legal
    sublane extent (d*ws % 8 == 0, or the full dimension)."""
    cands = [d for d in range(1, ho + 1)
             if ho % d == 0 and d * ws <= target_rows
             and (d == ho or (d * ws) % 8 == 0)]
    return max(cands) if cands else ho


def downsample_forward(x_nchw, conv_w, gamma, beta, *, size=4, stride=2, pad=1):
    """x_nchw: (N, Cin, H, W); conv_w: (Cout, Cin, K, K) (PyTorch layout)."""
    # TODO(synk): specialized to the module defaults K=4, stride=2, pad=1 (the
    # 2x2 space-to-depth factorization relies on K == 2*stride).
    assert size == 4 and stride == 2 and pad == 1
    N, Cin, H, W = x_nchw.shape
    Cout = conv_w.shape[0]
    assert H % 2 == 0 and W % 2 == 0
    Ho, Wo = H // 2, W // 2
    Hs, Ws = Ho + 1, Wo + 1
    C4 = 4 * Cin
    Coutp = ((Cout + LANES - 1) // LANES) * LANES
    M = N * Ho * Wo

    # ---- glue: NHWC, reflect pad, 2x2 space-to-depth, two bf16 row views ----
    x = jnp.transpose(x_nchw, (0, 2, 3, 1)).astype(jnp.float32)          # NHWC
    xp = jnp.pad(x, ((0, 0), (pad, pad), (pad, pad), (0, 0)), mode="reflect")
    xs = xp.reshape(N, Hs, 2, Ws, 2, Cin)
    xs = jnp.transpose(xs, (0, 1, 3, 2, 4, 5)).reshape(N, Hs, Ws, C4)
    xs = xs.astype(jnp.bfloat16)
    xa = xs[:, :Ho].reshape(N, Ho * Ws, C4)        # rows h     (bh = 0 taps)
    xb = xs[:, 1:].reshape(N, Ho * Ws, C4)         # rows h + 1 (bh = 1 taps)

    # weight (Cout, Cin, 4, 4) -> (tap = 2*bh+bw, dh*2Cin + dw*Cin + ci, Coutp)
    w = conv_w.astype(jnp.float32).reshape(Cout, Cin, 2, 2, 2, 2)
    w = jnp.transpose(w, (2, 4, 3, 5, 1, 0)).reshape(4, C4, Cout)
    w = jnp.pad(w, ((0, 0), (0, 0), (0, Coutp - Cout))).astype(jnp.bfloat16)

    g = jnp.pad(gamma.astype(jnp.float32), (0, Coutp - Cout)).reshape(1, Coutp)
    b = jnp.pad(beta.astype(jnp.float32), (0, Coutp - Cout)).reshape(1, Coutp)

    tile_h = _pick_tile_h(Ho, Ws)
    num_hb = Ho // tile_h
    L = tile_h * Ws

    cparams = pltpu.CompilerParams(
        dimension_semantics=("parallel", "parallel"),
        vmem_limit_bytes=48 * 1024 * 1024,
    )

    in_specs = [
        pl.BlockSpec((1, L, C4), lambda n, h: (n, h, 0)),
        pl.BlockSpec((1, L, C4), lambda n, h: (n, h, 0)),
        pl.BlockSpec((4, C4, Coutp), lambda n, h: (0, 0, 0)),
    ]
    conv_flops = 8 * N * Ho * Ws * C4 * Coutp
    in_bytes = 2 * N * Ho * Ws * C4 * 2 + 4 * C4 * Coutp * 2

    # ---- pass 1: conv matmuls -> per-tile BN partial sums only (tiny) ----
    psum, psumsq = pl.pallas_call(
        functools.partial(_conv_stats_kernel, ws=Ws),
        out_shape=(
            jax.ShapeDtypeStruct((N, num_hb, 1, Coutp), jnp.float32),
            jax.ShapeDtypeStruct((N, num_hb, 1, Coutp), jnp.float32),
        ),
        grid=(N, num_hb),
        in_specs=in_specs,
        out_specs=(
            pl.BlockSpec((1, 1, 1, Coutp), lambda n, h: (n, h, 0, 0)),
            pl.BlockSpec((1, 1, 1, Coutp), lambda n, h: (n, h, 0, 0)),
        ),
        compiler_params=cparams,
        cost_estimate=pl.CostEstimate(
            flops=conv_flops,
            transcendentals=0,
            bytes_accessed=in_bytes + 2 * N * num_hb * Coutp * 4,
        ),
    )(xa, xb, w)

    # ---- tiny JAX glue: fold partial sums into per-channel scale/shift ----
    # TODO(synk): BatchNorm running_mean/running_var buffers are not updated.
    mean = (jnp.sum(psum, axis=(0, 1, 2)) / M).reshape(1, Coutp)
    var = (jnp.sum(psumsq, axis=(0, 1, 2)) / M).reshape(1, Coutp) - mean * mean
    var = jnp.maximum(var, 0.0)
    scale = g * jax.lax.rsqrt(var + BN_EPS)
    shift = b - mean * scale

    # ---- pass 2: recompute conv, normalize + LeakyReLU, write output ----
    out = pl.pallas_call(
        _conv_bn_lrelu_kernel,
        out_shape=jax.ShapeDtypeStruct((N, Ho * Ws, Coutp), jnp.float32),
        grid=(N, num_hb),
        in_specs=in_specs + [
            pl.BlockSpec((1, Coutp), lambda n, h: (0, 0)),
            pl.BlockSpec((1, Coutp), lambda n, h: (0, 0)),
        ],
        out_specs=pl.BlockSpec((1, L, Coutp), lambda n, h: (n, h, 0)),
        compiler_params=cparams,
        cost_estimate=pl.CostEstimate(
            flops=conv_flops + 4 * N * Ho * Ws * Coutp,
            transcendentals=0,
            bytes_accessed=(in_bytes + 2 * Coutp * 4
                            + N * Ho * Ws * Coutp * 4),
        ),
    )(xa, xb, w, scale, shift)

    # ---- drop the garbage column and channel padding, back to NCHW ----
    out = out.reshape(N, Ho, Ws, Coutp)[:, :, :Wo, :Cout]
    return jnp.transpose(out, (0, 3, 1, 2))


def _reference_forward(x_nchw, conv_w, gamma, beta):
    """Pure-JAX reference (lax.conv) computed from the same bf16-rounded
    operands the kernel feeds to the MXU (f32 accumulation everywhere)."""
    x = x_nchw.astype(jnp.bfloat16).astype(jnp.float32)
    w = conv_w.astype(jnp.bfloat16).astype(jnp.float32)
    xpad = jnp.pad(x, ((0, 0), (0, 0), (1, 1), (1, 1)), mode="reflect")
    y = jax.lax.conv_general_dilated(
        xpad, w, window_strides=(2, 2), padding="VALID",
        dimension_numbers=("NCHW", "OIHW", "NCHW"),
        precision=jax.lax.Precision.HIGHEST,
    )
    mean = jnp.mean(y, axis=(0, 2, 3), keepdims=True)
    var = jnp.mean((y - mean) ** 2, axis=(0, 2, 3), keepdims=True)
    yh = (y - mean) * jax.lax.rsqrt(var + BN_EPS)
    yh = yh * gamma.reshape(1, -1, 1, 1) + beta.reshape(1, -1, 1, 1)
    return jnp.where(yh >= 0, yh, NEG_SLOPE * yh)


if __name__ == "__main__":
    # DownSample(in_channels=4, out_channels=8, size=4, batchnorm=True)
    N, Cin, Cout, H, W, K = 2, 4, 8, 16, 16, 4

    key = jax.random.PRNGKey(0)
    kx, kw = jax.random.split(key)
    x = jax.random.normal(kx, (N, Cin, H, W), dtype=jnp.float32)
    fan_in = Cin * K * K
    bound = 1.0 / np.sqrt(fan_in)
    conv_w = jax.random.uniform(
        kw, (Cout, Cin, K, K), minval=-bound, maxval=bound, dtype=jnp.float32)
    gamma = jnp.ones((Cout,), dtype=jnp.float32)   # BatchNorm2d default init
    beta = jnp.zeros((Cout,), dtype=jnp.float32)

    fwd = jax.jit(downsample_forward)
    out = jax.block_until_ready(fwd(x, conv_w, gamma, beta))

    ref = jax.block_until_ready(_reference_forward(x, conv_w, gamma, beta))
    np.testing.assert_allclose(np.asarray(out), np.asarray(ref),
                               rtol=5e-3, atol=5e-3)
    assert out.shape == (N, Cout, H // 2, W // 2)
    print("KERNEL_OK")
</pallas_src>

<mosaic_0001>
module attributes {stable_mosaic.version = 11 : i64} {
  func.func @_conv_stats_kernel(%arg0: i32, %arg1: i32, %arg2: memref<1x72x16xbf16, #tpu.memory_space<vmem>>, %arg3: memref<1x72x16xbf16, #tpu.memory_space<vmem>>, %arg4: memref<4x16x128xbf16, #tpu.memory_space<vmem>>, %arg5: memref<1x1x1x128xf32, #tpu.memory_space<vmem>>, %arg6: memref<1x1x1x128xf32, #tpu.memory_space<vmem>>) attributes {dimension_semantics = [#tpu.dimension_semantics<parallel>, #tpu.dimension_semantics<parallel>], iteration_bounds = array<i64: 2, 1>, scalar_prefetch = 0 : i64, scratch_operands = 0 : i64, tpu.core_type = #tpu.core_type<tc>, window_params = [{transform_indices = @transform_0, window_bounds = array<i64: 1, 72, 16>}, {transform_indices = @transform_1, window_bounds = array<i64: 1, 72, 16>}, {pipeline_mode = #tpu.pipeline_mode<synchronous>, transform_indices = @transform_2, window_bounds = array<i64: 4, 16, 128>}, {transform_indices = @transform_3, window_bounds = array<i64: 1, 1, 1, 128>}, {transform_indices = @transform_4, window_bounds = array<i64: 1, 1, 1, 128>}]} {
    %c0 = arith.constant 0 : index
    %c0_0 = arith.constant 0 : index
    %c0_1 = arith.constant 0 : index
    %0 = vector.load %arg2[%c0, %c0_0, %c0_1] : memref<1x72x16xbf16, #tpu.memory_space<vmem>>, vector<1x72x16xbf16>
    %1 = vector.shape_cast %0 : vector<1x72x16xbf16> to vector<72x16xbf16>
    %c0_2 = arith.constant 0 : index
    %c0_3 = arith.constant 0 : index
    %c0_4 = arith.constant 0 : index
    %2 = vector.load %arg3[%c0_2, %c0_3, %c0_4] : memref<1x72x16xbf16, #tpu.memory_space<vmem>>, vector<1x72x16xbf16>
    %3 = vector.shape_cast %2 : vector<1x72x16xbf16> to vector<72x16xbf16>
    %c0_5 = arith.constant 0 : index
    %c0_6 = arith.constant 0 : index
    %c0_7 = arith.constant 0 : index
    %4 = vector.load %arg4[%c0_5, %c0_6, %c0_7] : memref<4x16x128xbf16, #tpu.memory_space<vmem>>, vector<1x16x128xbf16>
    %5 = vector.shape_cast %4 : vector<1x16x128xbf16> to vector<16x128xbf16>
    %cst = arith.constant dense<0.000000e+00> : vector<72x128xf32>
    %6 = tpu.matmul %1, %5, %cst {dimension_numbers = #tpu.dot_dimension_numbers<[1], [0], [0], [1], [0, 0, 1, 1], [], []>} : vector<72x16xbf16>, vector<16x128xbf16>, vector<72x128xf32> -> vector<72x128xf32>
    %c1 = arith.constant 1 : index
    %c0_8 = arith.constant 0 : index
    %c0_9 = arith.constant 0 : index
    %7 = vector.load %arg4[%c1, %c0_8, %c0_9] : memref<4x16x128xbf16, #tpu.memory_space<vmem>>, vector<1x16x128xbf16>
    %8 = vector.shape_cast %7 : vector<1x16x128xbf16> to vector<16x128xbf16>
    %cst_10 = arith.constant dense<0.000000e+00> : vector<72x128xf32>
    %9 = tpu.matmul %1, %8, %cst_10 {dimension_numbers = #tpu.dot_dimension_numbers<[1], [0], [0], [1], [0, 0, 1, 1], [], []>} : vector<72x16xbf16>, vector<16x128xbf16>, vector<72x128xf32> -> vector<72x128xf32>
    %c2 = arith.constant 2 : index
    %c0_11 = arith.constant 0 : index
    %c0_12 = arith.constant 0 : index
    %10 = vector.load %arg4[%c2, %c0_11, %c0_12] : memref<4x16x128xbf16, #tpu.memory_space<vmem>>, vector<1x16x128xbf16>
    %11 = vector.shape_cast %10 : vector<1x16x128xbf16> to vector<16x128xbf16>
    %cst_13 = arith.constant dense<0.000000e+00> : vector<72x128xf32>
    %12 = tpu.matmul %3, %11, %cst_13 {dimension_numbers = #tpu.dot_dimension_numbers<[1], [0], [0], [1], [0, 0, 1, 1], [], []>} : vector<72x16xbf16>, vector<16x128xbf16>, vector<72x128xf32> -> vector<72x128xf32>
    %c3 = arith.constant 3 : index
    %c0_14 = arith.constant 0 : index
    %c0_15 = arith.constant 0 : index
    %13 = vector.load %arg4[%c3, %c0_14, %c0_15] : memref<4x16x128xbf16, #tpu.memory_space<vmem>>, vector<1x16x128xbf16>
    %14 = vector.shape_cast %13 : vector<1x16x128xbf16> to vector<16x128xbf16>
    %cst_16 = arith.constant dense<0.000000e+00> : vector<72x128xf32>
    %15 = tpu.matmul %3, %14, %cst_16 {dimension_numbers = #tpu.dot_dimension_numbers<[1], [0], [0], [1], [0, 0, 1, 1], [], []>} : vector<72x16xbf16>, vector<16x128xbf16>, vector<72x128xf32> -> vector<72x128xf32>
    %16 = arith.addf %9, %15 : vector<72x128xf32>
    %17 = vector.extract_strided_slice %16 {offsets = [1, 0], sizes = [71, 128], strides = [1, 1]} : vector<72x128xf32> to vector<71x128xf32>
    %cst_17 = arith.constant 0.000000e+00 : f32
    %18 = vector.broadcast %cst_17 : f32 to vector<1x128xf32>
    %19 = tpu.concatenate %17, %18 in 0 : vector<71x128xf32>, vector<1x128xf32> -> vector<72x128xf32>
    %20 = arith.addf %6, %12 : vector<72x128xf32>
    %21 = arith.addf %20, %19 : vector<72x128xf32>
    %22 = tpu.iota {dimensions = array<i32: 0>} : vector<72x128xi32>
    %c9_i32 = arith.constant 9 : i32
    %c0_i32 = arith.constant 0 : i32
    %23 = arith.cmpi eq, %c9_i32, %c0_i32 : i32
    %c1_i32 = arith.constant 1 : i32
    %24 = arith.select %23, %c1_i32, %c9_i32 : i32
    %25 = vector.broadcast %24 : i32 to vector<72x128xi32>
    %26 = arith.remsi %22, %25 : vector<72x128xi32>
    %c0_i32_18 = arith.constant 0 : i32
    %27 = vector.broadcast %c0_i32_18 : i32 to vector<72x128xi32>
    %28 = arith.cmpi ne, %26, %27 : vector<72x128xi32>
    %c0_i32_19 = arith.constant 0 : i32
    %29 = vector.broadcast %c0_i32_19 : i32 to vector<72x128xi32>
    %30 = arith.cmpi slt, %26, %29 : vector<72x128xi32>
    %c0_i32_20 = arith.constant 0 : i32
    %31 = arith.cmpi slt, %24, %c0_i32_20 : i32
    %32 = vector.broadcast %31 : i1 to vector<72x128xi1>
    %33 = vector.broadcast %32 : vector<72x128xi1> to vector<72x128xi1>
    %34 = arith.xori %30, %33 : vector<72x128xi1>
    %35 = arith.andi %34, %28 : vector<72x128xi1>
    %36 = vector.broadcast %24 : i32 to vector<72x128xi32>
    %37 = arith.addi %26, %36 : vector<72x128xi32>
    %38 = arith.select %35, %37, %26 : vector<72x128xi1>, vector<72x128xi32>
    %c8_i32 = arith.constant 8 : i32
    %39 = vector.broadcast %c8_i32 : i32 to vector<72x128xi32>
    %40 = arith.cmpi ne, %38, %39 : vector<72x128xi32>
    %cst_21 = arith.constant 0.000000e+00 : f32
    %41 = vector.broadcast %cst_21 : f32 to vector<72x128xf32>
    %42 = arith.select %40, %21, %41 : vector<72x128xi1>, vector<72x128xf32>
    %cst_22 = arith.constant dense<0.000000e+00> : vector<128xf32>
    %43 = vector.multi_reduction <add>, %42, %cst_22 [0] : vector<72x128xf32> to vector<128xf32>
    %44 = vector.shape_cast %43 : vector<128xf32> to vector<1x128xf32>
    %c0_23 = arith.constant 0 : index
    %c0_24 = arith.constant 0 : index
    %c0_25 = arith.constant 0 : index
    %c0_26 = arith.constant 0 : index
    %45 = vector.load %arg5[%c0_23, %c0_24, %c0_25, %c0_26] : memref<1x1x1x128xf32, #tpu.memory_space<vmem>>, vector<1x1x1x128xf32>
    %46 = vector.shape_cast %45 : vector<1x1x1x128xf32> to vector<1x128xf32>
    %47 = vector.shape_cast %44 : vector<1x128xf32> to vector<1x1x1x128xf32>
    tpu.vector_store %arg5[%c0_23, %c0_24, %c0_25, %c0_26], %47 {strides = array<i32>} : memref<1x1x1x128xf32, #tpu.memory_space<vmem>>, vector<1x1x1x128xf32>,
    %48 = arith.mulf %42, %42 : vector<72x128xf32>
    %cst_27 = arith.constant dense<0.000000e+00> : vector<128xf32>
    %49 = vector.multi_reduction <add>, %48, %cst_27 [0] : vector<72x128xf32> to vector<128xf32>
    %50 = vector.shape_cast %49 : vector<128xf32> to vector<1x128xf32>
    %c0_28 = arith.constant 0 : index
    %c0_29 = arith.constant 0 : index
    %c0_30 = arith.constant 0 : index
    %c0_31 = arith.constant 0 : index
    %51 = vector.load %arg6[%c0_28, %c0_29, %c0_30, %c0_31] : memref<1x1x1x128xf32, #tpu.memory_space<vmem>>, vector<1x1x1x128xf32>
    %52 = vector.shape_cast %51 : vector<1x1x1x128xf32> to vector<1x128xf32>
    %53 = vector.shape_cast %50 : vector<1x128xf32> to vector<1x1x1x128xf32>
    tpu.vector_store %arg6[%c0_28, %c0_29, %c0_30, %c0_31], %53 {strides = array<i32>} : memref<1x1x1x128xf32, #tpu.memory_space<vmem>>, vector<1x1x1x128xf32>,
    return
  }
  func.func @transform_0(%arg0: i32, %arg1: i32) -> (i32, i32, i32) {
    %c0_i32 = arith.constant 0 : i32
    %c0_i32_0 = arith.constant 0 : i32
    return %arg0, %arg1, %c0_i32 : i32, i32, i32
  }
  func.func @transform_1(%arg0: i32, %arg1: i32) -> (i32, i32, i32) {
    %c0_i32 = arith.constant 0 : i32
    %c0_i32_0 = arith.constant 0 : i32
    return %arg0, %arg1, %c0_i32 : i32, i32, i32
  }
  func.func @transform_2(%arg0: i32, %arg1: i32) -> (i32, i32, i32) {
    %c0_i32 = arith.constant 0 : i32
    %c0_i32_0 = arith.constant 0 : i32
    %c0_i32_1 = arith.constant 0 : i32
    %c0_i32_2 = arith.constant 0 : i32
    return %c0_i32, %c0_i32_0, %c0_i32_1 : i32, i32, i32
  }
  func.func @transform_3(%arg0: i32, %arg1: i32) -> (i32, i32, i32, i32) {
    %c0_i32 = arith.constant 0 : i32
    %c0_i32_0 = arith.constant 0 : i32
    %c0_i32_1 = arith.constant 0 : i32
    return %arg0, %arg1, %c0_i32, %c0_i32_0 : i32, i32, i32, i32
  }
  func.func @transform_4(%arg0: i32, %arg1: i32) -> (i32, i32, i32, i32) {
    %c0_i32 = arith.constant 0 : i32
    %c0_i32_0 = arith.constant 0 : i32
    %c0_i32_1 = arith.constant 0 : i32
    return %arg0, %arg1, %c0_i32, %c0_i32_0 : i32, i32, i32, i32
  }
}

module attributes {stable_mosaic.version = 11 : i64} {
  func.func @_conv_bn_lrelu_kernel(%arg0: i32, %arg1: i32, %arg2: memref<1x72x16xbf16, #tpu.memory_space<vmem>>, %arg3: memref<1x72x16xbf16, #tpu.memory_space<vmem>>, %arg4: memref<4x16x128xbf16, #tpu.memory_space<vmem>>, %arg5: memref<1x128xf32, #tpu.memory_space<vmem>>, %arg6: memref<1x128xf32, #tpu.memory_space<vmem>>, %arg7: memref<1x72x128xf32, #tpu.memory_space<vmem>>) attributes {dimension_semantics = [#tpu.dimension_semantics<parallel>, #tpu.dimension_semantics<parallel>], iteration_bounds = array<i64: 2, 1>, scalar_prefetch = 0 : i64, scratch_operands = 0 : i64, tpu.core_type = #tpu.core_type<tc>, window_params = [{transform_indices = @transform_0, window_bounds = array<i64: 1, 72, 16>}, {transform_indices = @transform_1, window_bounds = array<i64: 1, 72, 16>}, {pipeline_mode = #tpu.pipeline_mode<synchronous>, transform_indices = @transform_2, window_bounds = array<i64: 4, 16, 128>}, {pipeline_mode = #tpu.pipeline_mode<synchronous>, transform_indices = @transform_3, window_bounds = array<i64: 1, 128>}, {pipeline_mode = #tpu.pipeline_mode<synchronous>, transform_indices = @transform_4, window_bounds = array<i64: 1, 128>}, {transform_indices = @transform_5, window_bounds = array<i64: 1, 72, 128>}]} {
    %c0 = arith.constant 0 : index
    %c0_0 = arith.constant 0 : index
    %c0_1 = arith.constant 0 : index
    %0 = vector.load %arg2[%c0, %c0_0, %c0_1] : memref<1x72x16xbf16, #tpu.memory_space<vmem>>, vector<1x72x16xbf16>
    %1 = vector.shape_cast %0 : vector<1x72x16xbf16> to vector<72x16xbf16>
    %c0_2 = arith.constant 0 : index
    %c0_3 = arith.constant 0 : index
    %c0_4 = arith.constant 0 : index
    %2 = vector.load %arg3[%c0_2, %c0_3, %c0_4] : memref<1x72x16xbf16, #tpu.memory_space<vmem>>, vector<1x72x16xbf16>
    %3 = vector.shape_cast %2 : vector<1x72x16xbf16> to vector<72x16xbf16>
    %c0_5 = arith.constant 0 : index
    %c0_6 = arith.constant 0 : index
    %c0_7 = arith.constant 0 : index
    %4 = vector.load %arg4[%c0_5, %c0_6, %c0_7] : memref<4x16x128xbf16, #tpu.memory_space<vmem>>, vector<1x16x128xbf16>
    %5 = vector.shape_cast %4 : vector<1x16x128xbf16> to vector<16x128xbf16>
    %cst = arith.constant dense<0.000000e+00> : vector<72x128xf32>
    %6 = tpu.matmul %1, %5, %cst {dimension_numbers = #tpu.dot_dimension_numbers<[1], [0], [0], [1], [0, 0, 1, 1], [], []>} : vector<72x16xbf16>, vector<16x128xbf16>, vector<72x128xf32> -> vector<72x128xf32>
    %c1 = arith.constant 1 : index
    %c0_8 = arith.constant 0 : index
    %c0_9 = arith.constant 0 : index
    %7 = vector.load %arg4[%c1, %c0_8, %c0_9] : memref<4x16x128xbf16, #tpu.memory_space<vmem>>, vector<1x16x128xbf16>
    %8 = vector.shape_cast %7 : vector<1x16x128xbf16> to vector<16x128xbf16>
    %cst_10 = arith.constant dense<0.000000e+00> : vector<72x128xf32>
    %9 = tpu.matmul %1, %8, %cst_10 {dimension_numbers = #tpu.dot_dimension_numbers<[1], [0], [0], [1], [0, 0, 1, 1], [], []>} : vector<72x16xbf16>, vector<16x128xbf16>, vector<72x128xf32> -> vector<72x128xf32>
    %c2 = arith.constant 2 : index
    %c0_11 = arith.constant 0 : index
    %c0_12 = arith.constant 0 : index
    %10 = vector.load %arg4[%c2, %c0_11, %c0_12] : memref<4x16x128xbf16, #tpu.memory_space<vmem>>, vector<1x16x128xbf16>
    %11 = vector.shape_cast %10 : vector<1x16x128xbf16> to vector<16x128xbf16>
    %cst_13 = arith.constant dense<0.000000e+00> : vector<72x128xf32>
    %12 = tpu.matmul %3, %11, %cst_13 {dimension_numbers = #tpu.dot_dimension_numbers<[1], [0], [0], [1], [0, 0, 1, 1], [], []>} : vector<72x16xbf16>, vector<16x128xbf16>, vector<72x128xf32> -> vector<72x128xf32>
    %c3 = arith.constant 3 : index
    %c0_14 = arith.constant 0 : index
    %c0_15 = arith.constant 0 : index
    %13 = vector.load %arg4[%c3, %c0_14, %c0_15] : memref<4x16x128xbf16, #tpu.memory_space<vmem>>, vector<1x16x128xbf16>
    %14 = vector.shape_cast %13 : vector<1x16x128xbf16> to vector<16x128xbf16>
    %cst_16 = arith.constant dense<0.000000e+00> : vector<72x128xf32>
    %15 = tpu.matmul %3, %14, %cst_16 {dimension_numbers = #tpu.dot_dimension_numbers<[1], [0], [0], [1], [0, 0, 1, 1], [], []>} : vector<72x16xbf16>, vector<16x128xbf16>, vector<72x128xf32> -> vector<72x128xf32>
    %16 = arith.addf %9, %15 : vector<72x128xf32>
    %17 = vector.extract_strided_slice %16 {offsets = [1, 0], sizes = [71, 128], strides = [1, 1]} : vector<72x128xf32> to vector<71x128xf32>
    %cst_17 = arith.constant 0.000000e+00 : f32
    %18 = vector.broadcast %cst_17 : f32 to vector<1x128xf32>
    %19 = tpu.concatenate %17, %18 in 0 : vector<71x128xf32>, vector<1x128xf32> -> vector<72x128xf32>
    %20 = arith.addf %6, %12 : vector<72x128xf32>
    %21 = arith.addf %20, %19 : vector<72x128xf32>
    %c0_18 = arith.constant 0 : index
    %c0_19 = arith.constant 0 : index
    %22 = vector.load %arg5[%c0_18, %c0_19] : memref<1x128xf32, #tpu.memory_space<vmem>>, vector<1x128xf32>
    %23 = vector.broadcast %22 : vector<1x128xf32> to vector<72x128xf32>
    %24 = arith.mulf %21, %23 : vector<72x128xf32>
    %c0_20 = arith.constant 0 : index
    %c0_21 = arith.constant 0 : index
    %25 = vector.load %arg6[%c0_20, %c0_21] : memref<1x128xf32, #tpu.memory_space<vmem>>, vector<1x128xf32>
    %26 = vector.broadcast %25 : vector<1x128xf32> to vector<72x128xf32>
    %27 = arith.addf %24, %26 : vector<72x128xf32>
    %cst_22 = arith.constant 0.000000e+00 : f32
    %28 = vector.broadcast %cst_22 : f32 to vector<72x128xf32>
    %29 = arith.cmpf oge, %27, %28 : vector<72x128xf32>
    %cst_23 = arith.constant 2.000000e-01 : f32
    %30 = vector.broadcast %cst_23 : f32 to vector<72x128xf32>
    %31 = arith.mulf %30, %27 : vector<72x128xf32>
    %32 = arith.select %29, %27, %31 : vector<72x128xi1>, vector<72x128xf32>
    %c0_24 = arith.constant 0 : index
    %c0_25 = arith.constant 0 : index
    %c0_26 = arith.constant 0 : index
    %33 = vector.load %arg7[%c0_24, %c0_25, %c0_26] : memref<1x72x128xf32, #tpu.memory_space<vmem>>, vector<1x72x128xf32>
    %34 = vector.shape_cast %33 : vector<1x72x128xf32> to vector<72x128xf32>
    %35 = vector.shape_cast %32 : vector<72x128xf32> to vector<1x72x128xf32>
    tpu.vector_store %arg7[%c0_24, %c0_25, %c0_26], %35 {strides = array<i32>} : memref<1x72x128xf32, #tpu.memory_space<vmem>>, vector<1x72x128xf32>,
    return
  }
  func.func @transform_0(%arg0: i32, %arg1: i32) -> (i32, i32, i32) {
    %c0_i32 = arith.constant 0 : i32
    %c0_i32_0 = arith.constant 0 : i32
    return %arg0, %arg1, %c0_i32 : i32, i32, i32
  }
  func.func @transform_1(%arg0: i32, %arg1: i32) -> (i32, i32, i32) {
    %c0_i32 = arith.constant 0 : i32
    %c0_i32_0 = arith.constant 0 : i32
    return %arg0, %arg1, %c0_i32 : i32, i32, i32
  }
  func.func @transform_2(%arg0: i32, %arg1: i32) -> (i32, i32, i32) {
    %c0_i32 = arith.constant 0 : i32
    %c0_i32_0 = arith.constant 0 : i32
    %c0_i32_1 = arith.constant 0 : i32
    %c0_i32_2 = arith.constant 0 : i32
    return %c0_i32, %c0_i32_0, %c0_i32_1 : i32, i32, i32
  }
  func.func @transform_3(%arg0: i32, %arg1: i32) -> (i32, i32) {
    %c0_i32 = arith.constant 0 : i32
    %c0_i32_0 = arith.constant 0 : i32
    %c0_i32_1 = arith.constant 0 : i32
    return %c0_i32, %c0_i32_0 : i32, i32
  }
  func.func @transform_4(%arg0: i32, %arg1: i32) -> (i32, i32) {
    %c0_i32 = arith.constant 0 : i32
    %c0_i32_0 = arith.constant 0 : i32
    %c0_i32_1 = arith.constant 0 : i32
    return %c0_i32, %c0_i32_0 : i32, i32
  }
  func.func @transform_5(%arg0: i32, %arg1: i32) -> (i32, i32, i32) {
    %c0_i32 = arith.constant 0 : i32
    %c0_i32_0 = arith.constant 0 : i32
    return %arg0, %arg1, %c0_i32 : i32, i32, i32
  }
}

</mosaic_0001>

<bundles_post_ra>
// kernel: downsample_forward.3
= control target key start
LH: loop header
LB: loop body
LE: loop exit
PB: predicated region body
PF: predicated region fallthrough
CT: control target
= control target key end

     0   :  { %s1220_s18 = smov 0   ;;  %s1222_s19 = smov 0   ;;  %s1403_s0 = inlined_call_operand.vmem [shape: bf16[2,72,16], index: 0, kind: input, shape index: {}]   ;;  %s1404_s1 = inlined_call_operand.vmem [shape: bf16[2,72,16], index: 1, kind: input, shape index: {}]   ;;  %s1405_s2 = inlined_call_operand.vmem [shape: bf16[4,16,128], index: 2, kind: input, shape index: {}]   ;;  %s1406_s3 = inlined_call_operand.vmem [shape: f32[1,128], index: 3, kind: input, shape index: {}]   ;;  %s1407_s4 = inlined_call_operand.vmem [shape: f32[1,128], index: 4, kind: input, shape index: {}]   ;;  %s1408_s5 = inlined_call_operand.vmem [shape: f32[2,72,128], index: 5, kind: output, shape index: {}]  }
   0x1   :  { %s1224_s20 = smov 0  }
   0x2 LB: > { %s27_s21 = sadd.s32 1, %s1182_s19  ;;  %p942_p0 = scmp.ge.s32.totalorder %s1186_s20, 1  ;;  %s1186_s20 = sphi %s1224_s20, %s15_s20   ;;  %s1182_s19 = sphi %s1222_s19, %s1410_s19   ;;  %s1178_s18 = sphi %s1220_s18, %s1409_s18  }
   0x3   : > { %p29_p1 = scmp.ge.s32.totalorder %s27_s21, 2  ;;  %p225_p2 = scmp.lt.s32.totalorder %s1186_s20, 3 }
   0x5   : > { %s1412_s21 = smov (%p29_p1, %s27_s21), 0  ;;  %p226_p3 = pnand %p942_p0, %p225_p2 }
   0x6   : > { %v1150_v0 = vld [vmem:[%s1405_s2 + $0x18] sm:$0xff] (!%p226_p3)   ;;  %v1188_v1 = vmov (!%p226_p3), 0.0   ;;  %v1151_v2 = vld [vmem:[%s1405_s2 + $0x10] sm:$0xff] (!%p226_p3)   ;;  %vm1189_vm0 = vmmov (!%p226_p3), 0   ;;  %p271_p4 = scmp.lt.s32.totalorder (!%p226_p3), %s1178_s18, 1  ;;  %vm356_vm1 = vcmask (!%p226_p3), 130048  }
   0x7   : > { %229 = sbr.rel (%p226_p3) target bundleno = 317 (0x13d), region = 40  ;;  %1036 = vmatprep.subr.bf16.mxu1 (!%p226_p3), %v1188_v1  ;;  %1014 = vmatprep.subr.bf16.mxu0 (!%p226_p3), %v1188_v1  ;;  %v1153_v3 = vld [vmem:[%s1405_s2 + $0x8] sm:$0xff] (!%p226_p3)   ;;  %v1154_v4 = vld [vmem:[%s1405_s2] sm:$0xff] (!%p226_p3)   ;;  %vm650_vm2 = vcmask (!%p226_p3), 1046528  }
   0x8   : > { %1037 = vmatpush3.bf16.msra.mxu1 (!%p226_p3), %v1150_v0  ;;  %1016 = vmatprep.mubr.msk.bf16.mxu0 (!%p226_p3), %vm1189_vm0, %v1188_v1  ;;  %v1342_v48 = vld [vmem:[%s1406_s3] ss:$0 sm:$0xff] (!%p226_p3) }
   0x9   : > { %1015 = vmatpush3.bf16.msra.mxu0 (!%p226_p3), %v1151_v2  ;;  %1038 = vmatprep.mubr.msk.bf16.mxu1 (!%p226_p3), %vm1189_vm0, %v1188_v1  ;;  %v1347_v50 = vld [vmem:[%s1407_s4] ss:$0 sm:$0xff] (!%p226_p3) }
   0xa   : > { %1058 = vmatprep.subr.bf16.mxu1 (!%p226_p3), %v1188_v1  ;;  %1080 = vmatprep.subr.bf16.mxu0 (!%p226_p3), %v1188_v1 }
   0xe   : > { %s1414_s18 = smov (!%p271_p4, %s1178_s18), 1 }
   0xf   : > { %s1122_s26 = smul.u32 36, %s1414_s18 }
  0x10   : > { %s1123_s16 = smul.u32 72, %s1414_s18 }
  0x11   : > { %s288_s29 = scalar_lea.vmem %s1404_s1, %s1122_s26  ;;  %s1269_s11 = scalar_lea.vmem %s1403_s0, %s1122_s26 }
  0x12   : > { %v1152_v5 = vld [vmem:[%s288_s29] sm:$0xff]   ;;  %v1155_v6 = vld [vmem:[%s288_s29 + $0x8] sm:$0xff]   ;;  %v1156_v7 = vld [vmem:[%s288_s29 + $0x10] sm:$0xff]   ;;  %s1356_s22 = scalar_lea.vmem %s1408_s5, %s1123_s16 }
  0x13   : > { %1017 = vmatmul.mubr.msk.bf16.vlgmr.msra.gmra.mrb[0].mxu0 %vm356_vm1, %v1152_v5  ;;  %1039 = vmatmul.mubr.msk.bf16.vlgmr.msra.gmra.mrb[0].mxu1 %vm356_vm1, %v1152_v5  ;;  %v1157_v8 = vld [vmem:[%s288_s29 + $0x18] sm:$0xff]   ;;  %v1158_v9 = vld [vmem:[%s288_s29 + $0x20] ss:$0 sps:$4 sm:$0xff]   ;;  %v1160_v11 = vld [vmem:[%s1269_s11 + $0x8] sm:$0xff]  }
  0x14   : > { %1059 = vmatpush3.bf16.msra.mxu1 %v1153_v3  ;;  %1081 = vmatpush3.bf16.msra.mxu0 %v1154_v4  ;;  %v1159_v10 = vld [vmem:[%s1269_s11] sm:$0xff]   ;;  %v1161_v12 = vld [vmem:[%s1269_s11 + $0x10] sm:$0xff]   ;;  %v1162_v13 = vld [vmem:[%s1269_s11 + $0x18] sm:$0xff]  }
  0x15   : > { %1020 = vmatprep.mubr.msk.bf16.mxu0 %vm1189_vm0, %v1188_v1  ;;  %1042 = vmatprep.mubr.msk.bf16.mxu1 %vm1189_vm0, %v1188_v1  ;;  %v1163_v14 = vld [vmem:[%s1269_s11 + $0x20] ss:$0 sps:$4 sm:$0xff]  }
  0x1b   : > { %1021 = vmatmul.mubr.msk.bf16.gmra.mrb[4].mxu0 %vm356_vm1, %v1155_v6  ;;  %1043 = vmatmul.mubr.msk.bf16.gmra.mrb[4].mxu1 %vm356_vm1, %v1155_v6 }
  0x1c   : > { %1024 = vmatprep.mubr.msk.bf16.mxu0 %vm1189_vm0, %v1188_v1  ;;  %1046 = vmatprep.mubr.msk.bf16.mxu1 %vm1189_vm0, %v1188_v1 }
  0x23   : > { %1025 = vmatmul.mubr.msk.bf16.gmra.mrb[8].mxu0 %vm356_vm1, %v1156_v7  ;;  %1047 = vmatmul.mubr.msk.bf16.gmra.mrb[8].mxu1 %vm356_vm1, %v1156_v7 }
  0x24   : > { %1028 = vmatprep.mubr.msk.bf16.mxu0 %vm1189_vm0, %v1188_v1  ;;  %1050 = vmatprep.mubr.msk.bf16.mxu1 %vm1189_vm0, %v1188_v1 }
  0x2b   : > { %1029 = vmatmul.mubr.msk.bf16.gmra.mrb[12].mxu0 %vm356_vm1, %v1157_v8  ;;  %1051 = vmatmul.mubr.msk.bf16.gmra.mrb[12].mxu1 %vm356_vm1, %v1157_v8 }
  0x2c   : > { %1032 = vmatprep.mubr.msk.bf16.mxu0 %vm1189_vm0, %v1188_v1  ;;  %1054 = vmatprep.mubr.msk.bf16.mxu1 %vm1189_vm0, %v1188_v1 }
  0x33   : > { %1033 = vmatmul.mubr.msk.bf16.gmra.mrb[16].mxu0 %vm356_vm1, %v1158_v9  ;;  %1055 = vmatmul.mubr.msk.bf16.gmra.mrb[16].mxu1 %vm356_vm1, %v1158_v9 }
  0x34   : > { %1060 = vmatprep.mubr.msk.bf16.mxu1 %vm1189_vm0, %v1188_v1  ;;  %1082 = vmatprep.mubr.msk.bf16.mxu0 %vm1189_vm0, %v1188_v1 }
  0x3b   : > { %1061 = vmatmul.mubr.msk.bf16.vlgmr.msra.gmra.mrb[0].mxu1 %vm356_vm1, %v1159_v10  ;;  %1083 = vmatmul.mubr.msk.bf16.vlgmr.msra.gmra.mrb[20].mxu0 %vm356_vm1, %v1159_v10 }
  0x3c   : > { %1064 = vmatprep.mubr.msk.bf16.mxu1 %vm1189_vm0, %v1188_v1  ;;  %1086 = vmatprep.mubr.msk.bf16.mxu0 %vm1189_vm0, %v1188_v1 }
  0x43   : > { %1065 = vmatmul.mubr.msk.bf16.gmra.mrb[4].mxu1 %vm356_vm1, %v1160_v11  ;;  %1087 = vmatmul.mubr.msk.bf16.gmra.mrb[24].mxu0 %vm356_vm1, %v1160_v11 }
  0x44   : > { %1068 = vmatprep.mubr.msk.bf16.mxu1 %vm1189_vm0, %v1188_v1  ;;  %1090 = vmatprep.mubr.msk.bf16.mxu0 %vm1189_vm0, %v1188_v1 }
  0x4b   : > { %1069 = vmatmul.mubr.msk.bf16.gmra.mrb[8].mxu1 %vm356_vm1, %v1161_v12  ;;  %1091 = vmatmul.mubr.msk.bf16.gmra.mrb[28].mxu0 %vm356_vm1, %v1161_v12 }
  0x4c   : > { %1072 = vmatprep.mubr.msk.bf16.mxu1 %vm1189_vm0, %v1188_v1  ;;  %1094 = vmatprep.mubr.msk.bf16.mxu0 %vm1189_vm0, %v1188_v1 }
  0x53   : > { %1073 = vmatmul.mubr.msk.bf16.gmra.mrb[12].mxu1 %vm356_vm1, %v1162_v13  ;;  %1095 = vmatmul.mubr.msk.bf16.gmra.mrb[32].mxu0 %vm356_vm1, %v1162_v13 }
  0x54   : > { %1076 = vmatprep.mubr.msk.bf16.mxu1 %vm1189_vm0, %v1188_v1  ;;  %1098 = vmatprep.mubr.msk.bf16.mxu0 %vm1189_vm0, %v1188_v1 }
  0x5b   : > { %1077 = vmatmul.mubr.msk.bf16.gmra.mrb[16].mxu1 %vm356_vm1, %v1163_v14  ;;  %1099 = vmatmul.mubr.msk.bf16.gmra.mrb[36].mxu0 %vm356_vm1, %v1163_v14 }
  0xe6   : > { %v406_v15 = vpop.f32.mrb[0].mxu0 }
  0xe7   : > { %v1018_v16 = vpop.f32.mrb[1].mxu0 }
  0xe8   : > { %v409_v17 = vpop.f32.mrb[2].mxu0 }
  0xe9   : > { %v1019_v18 = vpop.f32.mrb[3].mxu0 }
  0xee   : > { %v414_v19 = vpop.f32.mrb[4].mxu0 }
  0xef   : > { %v1022_v20 = vpop.f32.mrb[5].mxu0 }
  0xf0   : > { %v417_v21 = vpop.f32.mrb[6].mxu0 }
  0xf1   : > { %v1023_v22 = vpop.f32.mrb[7].mxu0 }
  0xf6   : > { %v422_v23 = vpop.f32.mrb[8].mxu0 }
  0xf7   : > { %v1026_v24 = vpop.f32.mrb[9].mxu0 }
  0xf8   : > { %v1330_v25 = vpop.f32.mrb[10].mxu0 }
  0xf9   : > { %v1027_v26 = vpop.f32.mrb[11].mxu0 }
  0xfe   : > { %v1332_v27 = vpop.f32.mrb[12].mxu0 }
  0xff   : > { %v1030_v28 = vpop.f32.mrb[13].mxu0 }
 0x100   : > { %v1334_v29 = vpop.f32.mrb[14].mxu0 }
 0x101   : > { %v1031_v30 = vpop.f32.mrb[15].mxu0 }
 0x106   : > { %v1336_v31 = vpop.f32.mrb[16].mxu0 }
 0x107   : > { %v1034_v32 = vpop.f32.mrb[17].mxu0 }
 0x108   : > { %v441_v33 = vpop.f32.mrb[18].mxu0 }
 0x109   : > { %v1035_v34 = vpop.f32.mrb[19].mxu0 }
 0x10e   : > { %v603_v35 = vpop.f32.mrb[0].mxu1  ;;  %v718_v36 = vpop.f32.mrb[20].mxu0 }
 0x10f   : > { %v719_v37 = vadd.f32 %v718_v36, %v406_v15  ;;  %v1062_v38 = vpop.f32.mrb[1].mxu1  ;;  %v1084_v39 = vpop.f32.mrb[21].mxu0  ;;  %v651_v42 = vrot.slane %v603_v35, 1 }
 0x110   : > { %v606_v40 = vpop.f32.mrb[2].mxu1  ;;  %v721_v41 = vpop.f32.mrb[22].mxu0 }
 0x111   : > { %v652_v43 = vrot.slane %v606_v40, 1  ;;  %v722_v44 = vadd.f32 %v721_v41, %v409_v17  ;;  %v1063_v45 = vpop.f32.mrb[3].mxu1  ;;  %v1085_v46 = vpop.f32.mrb[23].mxu0 }
 0x113   : > { %v653_v47 = vsel %vm650_vm2, %v651_v42, %v652_v43 }
 0x114   : > { %v756_v49 = vadd.f32 %v719_v37, %v653_v47 }
 0x116   : > { %v772_v51 = vmul.f32 %v1342_v48, %v756_v49  ;;  %v611_v52 = vpop.f32.mrb[4].mxu1  ;;  %v726_v53 = vpop.f32.mrb[24].mxu0 }
 0x117   : > { %v654_v54 = vrot.slane %v611_v52, 1  ;;  %v727_v55 = vadd.f32 %v726_v53, %v414_v19  ;;  %v1066_v56 = vpop.f32.mrb[5].mxu1  ;;  %v1088_v57 = vpop.f32.mrb[25].mxu0 }
 0x118   : > { %v788_v58 = vadd.f32 %v1347_v50, %v772_v51  ;;  %v614_v59 = vpop.f32.mrb[6].mxu1  ;;  %v729_v60 = vpop.f32.mrb[26].mxu0 }
 0x119   : > { %v655_v61 = vsel %vm650_vm2, %v652_v43, %v654_v54  ;;  %v656_v62 = vrot.slane %v614_v59, 1  ;;  %v730_v63 = vadd.f32 %v729_v60, %v417_v21  ;;  %v1067_v0 = vpop.f32.mrb[7].mxu1  ;;  %v1089_v1 = vpop.f32.mrb[27].mxu0 }
 0x11a   : > { %vm797_vm3 = vcmp.ge.f32.partialorder %v788_v58, 0.0  ;;  %v806_v2 = vmul.f32 0.2, %v788_v58  ;;  %v757_v3 = vadd.f32 %v722_v44, %v655_v61 }
 0x11b   : > { %v657_v4 = vsel %vm650_vm2, %v654_v54, %v656_v62 }
 0x11c   : > { %v815_v5 = vsel %vm797_vm3, %v788_v58, %v806_v2  ;;  %v773_v6 = vmul.f32 %v1342_v48, %v757_v3  ;;  %v758_v7 = vadd.f32 %v727_v55, %v657_v4 }
 0x11d   : > { %824 = vst [vmem:[%s1356_s22] sm:$0xff] %v815_v5 }
 0x11e   : > { %v789_v8 = vadd.f32 %v1347_v50, %v773_v6  ;;  %v774_v9 = vmul.f32 %v1342_v48, %v758_v7  ;;  %v619_v10 = vpop.f32.mrb[8].mxu1  ;;  %v734_v11 = vpop.f32.mrb[28].mxu0 }
 0x11f   : > { %v658_v12 = vrot.slane %v619_v10, 1  ;;  %v735_v13 = vadd.f32 %v734_v11, %v422_v23  ;;  %v1070_v14 = vpop.f32.mrb[9].mxu1  ;;  %v1092_v15 = vpop.f32.mrb[29].mxu0 }
 0x120   : > { %vm798_vm4 = vcmp.ge.f32.partialorder %v789_v8, 0.0  ;;  %v807_v16 = vmul.f32 0.2, %v789_v8  ;;  %v790_v17 = vadd.f32 %v1347_v50, %v774_v9  ;;  %v622_v18 = vpop.f32.mrb[10].mxu1  ;;  %v737_v19 = vpop.f32.mrb[30].mxu0 }
 0x121   : > { %v659_v20 = vsel %vm650_vm2, %v656_v62, %v658_v12  ;;  %v660_v21 = vrot.slane %v622_v18, 1  ;;  %v738_v22 = vadd.f32 %v737_v19, %v1330_v25  ;;  %v1071_v24 = vpop.f32.mrb[11].mxu1  ;;  %v1093_v26 = vpop.f32.mrb[31].mxu0 }
 0x122   : > { %v816_v28 = vsel %vm798_vm4, %v789_v8, %v807_v16  ;;  %vm799_vm5 = vcmp.ge.f32.partialorder %v790_v17, 0.0  ;;  %v808_v23 = vmul.f32 0.2, %v790_v17  ;;  %v759_v30 = vadd.f32 %v730_v63, %v659_v20 }
 0x123   : > { %825 = vst [vmem:[%s1356_s22 + $0x8] sm:$0xff] %v816_v28  ;;  %v661_v32 = vsel %vm650_vm2, %v658_v12, %v660_v21 }
 0x124   : > { %v817_v33 = vsel %vm799_vm5, %v790_v17, %v808_v23  ;;  %v775_v34 = vmul.f32 %v1342_v48, %v759_v30  ;;  %v760_v35 = vadd.f32 %v735_v13, %v661_v32 }
 0x125   : > { %826 = vst [vmem:[%s1356_s22 + $0x10] sm:$0xff] %v817_v33 }
 0x126   : > { %v791_v36 = vadd.f32 %v1347_v50, %v775_v34  ;;  %v776_v37 = vmul.f32 %v1342_v48, %v760_v35  ;;  %v627_v38 = vpop.f32.mrb[12].mxu1  ;;  %v742_v25 = vpop.f32.mrb[32].mxu0 }
 0x127   : > { %v662_v39 = vrot.slane %v627_v38, 1  ;;  %v743_v40 = vadd.f32 %v742_v25, %v1332_v27  ;;  %v1074_v41 = vpop.f32.mrb[13].mxu1  ;;  %v1096_v42 = vpop.f32.mrb[33].mxu0 }
 0x128   : > { %vm800_vm6 = vcmp.ge.f32.partialorder %v791_v36, 0.0  ;;  %v809_v43 = vmul.f32 0.2, %v791_v36  ;;  %v792_v44 = vadd.f32 %v1347_v50, %v776_v37  ;;  %v630_v45 = vpop.f32.mrb[14].mxu1  ;;  %v745_v46 = vpop.f32.mrb[34].mxu0 }
 0x129   : > { %v663_v47 = vsel %vm650_vm2, %v660_v21, %v662_v39  ;;  %v664_v49 = vrot.slane %v630_v45, 1  ;;  %v746_v51 = vadd.f32 %v745_v46, %v1334_v29  ;;  %v1075_v52 = vpop.f32.mrb[15].mxu1  ;;  %v1097_v53 = vpop.f32.mrb[35].mxu0 }
 0x12a   : > { %v818_v54 = vsel %vm800_vm6, %v791_v36, %v809_v43  ;;  %vm801_vm7 = vcmp.ge.f32.partialorder %v792_v44, 0.0  ;;  %v810_v27 = vmul.f32 0.2, %v792_v44  ;;  %v761_v55 = vadd.f32 %v738_v22, %v663_v47 }
 0x12b   : > { %827 = vst [vmem:[%s1356_s22 + $0x18] sm:$0xff] %v818_v54  ;;  %v665_v56 = vsel %vm650_vm2, %v662_v39, %v664_v49 }
 0x12c   : > { %v819_v57 = vsel %vm801_vm7, %v792_v44, %v810_v27  ;;  %v777_v58 = vmul.f32 %v1342_v48, %v761_v55  ;;  %v762_v59 = vadd.f32 %v743_v40, %v665_v56 }
 0x12d   : > { %828 = vst [vmem:[%s1356_s22 + $0x20] sm:$0xff] %v819_v57 }
 0x12e   : > { %v793_v60 = vadd.f32 %v1347_v50, %v777_v58  ;;  %v778_v61 = vmul.f32 %v1342_v48, %v762_v59  ;;  %v635_v62 = vpop.f32.mrb[16].mxu1  ;;  %v750_v29 = vpop.f32.mrb[36].mxu0 }
 0x12f   : > { %v666_v63 = vrot.slane %v635_v62, 1  ;;  %v751_v0 = vadd.f32 %v750_v29, %v1336_v31  ;;  %v1078_v1 = vpop.f32.mrb[17].mxu1  ;;  %v1100_v2 = vpop.f32.mrb[37].mxu0 }
 0x130   : > { %vm802_vm8 = vcmp.ge.f32.partialorder %v793_v60, 0.0  ;;  %v811_v3 = vmul.f32 0.2, %v793_v60  ;;  %v794_v4 = vadd.f32 %v1347_v50, %v778_v61  ;;  %v638_v5 = vpop.f32.mrb[18].mxu1  ;;  %v753_v6 = vpop.f32.mrb[38].mxu0 }
 0x131   : > { %v667_v7 = vsel %vm650_vm2, %v664_v49, %v666_v63  ;;  %v677_v8 = vsel %vm650_vm2, %v666_v63, 0.0  ;;  %v1079_v9 = vpop.f32.mrb[19].mxu1  ;;  %v1101_v10 = vpop.f32.mrb[39].mxu0 }
 0x132   : > { %v820_v11 = vsel %vm802_vm8, %v793_v60, %v811_v3  ;;  %vm803_vm9 = vcmp.ge.f32.partialorder %v794_v4, 0.0  ;;  %v812_v31 = vmul.f32 0.2, %v794_v4  ;;  %v763_v12 = vadd.f32 %v746_v51, %v667_v7 }
 0x133   : > { %829 = vst [vmem:[%s1356_s22 + $0x28] sm:$0xff] %v820_v11  ;;  %v764_v13 = vadd.f32 %v751_v0, %v677_v8 }
 0x134   : > { %v821_v14 = vsel %vm803_vm9, %v794_v4, %v812_v31  ;;  %v779_v15 = vmul.f32 %v1342_v48, %v763_v12 }
 0x135   : > { %830 = vst [vmem:[%s1356_s22 + $0x30] sm:$0xff] %v821_v14  ;;  %v780_v16 = vmul.f32 %v1342_v48, %v764_v13 }
 0x136   : > { %v795_v17 = vadd.f32 %v1347_v50, %v779_v15 }
 0x137   : > { %v796_v18 = vadd.f32 %v1347_v50, %v780_v16 }
 0x138   : > { %vm804_vm10 = vcmp.ge.f32.partialorder %v795_v17, 0.0  ;;  %v813_v19 = vmul.f32 0.2, %v795_v17 }
 0x139   : > { %vm805_vm11 = vcmp.ge.f32.partialorder %v796_v18, 0.0  ;;  %v814_v20 = vmul.f32 0.2, %v796_v18 }
 0x13a   : > { %v822_v21 = vsel %vm804_vm10, %v795_v17, %v813_v19 }
 0x13b   : > { %831 = vst [vmem:[%s1356_s22 + $0x38] sm:$0xff] %v822_v21  ;;  %v823_v22 = vsel %vm805_vm11, %v796_v18, %v814_v20 }
 0x13c   : > { %832 = vst [vmem:[%s1356_s22 + $0x40] sm:$0xff] %v823_v22 }
 0x13d PF: > { %s15_s20 = sadd.s32 1, %s1186_s20   ;;  %s1409_s18 = smov %s1182_s19 }
 0x13e   : > { %p12_p5 = scmp.ge.s32.totalorder %s15_s20, 4   ;;  %s1410_s19 = smov %s1412_s21 }
 0x140   :  { %14 = sbr.rel (!%p12_p5) target bundleno = 2 (0x2), region = 76 }

// kernel: downsample_forward.2
= control target key start
LH: loop header
LB: loop body
LE: loop exit
PB: predicated region body
PF: predicated region fallthrough
CT: control target
= control target key end

     0   :  { %s1374_s15 = smov 0   ;;  %s1376_s16 = smov 0   ;;  %s1729_s0 = inlined_call_operand.vmem [shape: bf16[2,72,16], index: 0, kind: input, shape index: {}]   ;;  %s1730_s1 = inlined_call_operand.vmem [shape: bf16[2,72,16], index: 1, kind: input, shape index: {}]   ;;  %s1731_s2 = inlined_call_operand.vmem [shape: bf16[4,16,128], index: 2, kind: input, shape index: {}]   ;;  %s1732_s3 = inlined_call_operand.vmem [shape: f32[2,1,1,128], index: 3, kind: output, shape index: {0}]   ;;  %s1733_s4 = inlined_call_operand.vmem [shape: f32[2,1,1,128], index: 4, kind: output, shape index: {1}]  }
   0x1   :  { %s1378_s17 = smov 0  }
   0x2 LB: > { %s27_s18 = sadd.s32 1, %s1341_s16  ;;  %p1087_p0 = scmp.ge.s32.totalorder %s1345_s17, 1  ;;  %s1345_s17 = sphi %s1378_s17, %s15_s17   ;;  %s1341_s16 = sphi %s1376_s16, %s1761_s16   ;;  %s1337_s15 = sphi %s1374_s15, %s1760_s15  }
   0x3   : > { %p29_p1 = scmp.ge.s32.totalorder %s27_s18, 2  ;;  %p205_p2 = scmp.lt.s32.totalorder %s1345_s17, 3 }
   0x5   : > { %s1763_s18 = smov (%p29_p1, %s27_s18), 0  ;;  %p206_p3 = pnand %p1087_p0, %p205_p2 }
   0x6   : > { %v1309_v0 = vld [vmem:[%s1731_s2 + $0x18] sm:$0xff] (!%p206_p3)   ;;  %v1347_v1 = vmov (!%p206_p3), 0.0   ;;  %v1310_v2 = vld [vmem:[%s1731_s2 + $0x10] sm:$0xff] (!%p206_p3)   ;;  %vm1348_vm0 = vmmov (!%p206_p3), 0   ;;  %p252_p4 = scmp.lt.s32.totalorder (!%p206_p3), %s1337_s15, 1  ;;  %vm339_vm1 = vcmask (!%p206_p3), 130048   ;;  %v748_v19 = vlaneseq (!%p206_p3) }
   0x7   : > { %209 = sbr.rel (%p206_p3) target bundleno = 328 (0x148), region = 32  ;;  %1178 = vmatprep.subr.bf16.mxu1 (!%p206_p3), %v1347_v1  ;;  %1156 = vmatprep.subr.bf16.mxu0 (!%p206_p3), %v1347_v1  ;;  %v1312_v3 = vld [vmem:[%s1731_s2 + $0x8] sm:$0xff] (!%p206_p3)   ;;  %v1313_v4 = vld [vmem:[%s1731_s2] sm:$0xff] (!%p206_p3)   ;;  %vm633_vm8 = vcmask (!%p206_p3), 1046528  }
   0x8   : > { %1179 = vmatpush3.bf16.msra.mxu1 (!%p206_p3), %v1309_v0  ;;  %1158 = vmatprep.mubr.msk.bf16.mxu0 (!%p206_p3), %vm1348_vm0, %v1347_v1  ;;  %v1492_v23 = vshrl.u32 (!%p206_p3), %v748_v19, 7 }
   0x9   : > { %1157 = vmatpush3.bf16.msra.mxu0 (!%p206_p3), %v1310_v2  ;;  %1180 = vmatprep.mubr.msk.bf16.mxu1 (!%p206_p3), %vm1348_vm0, %v1347_v1 }
   0xa   : > { %1200 = vmatprep.subr.bf16.mxu1 (!%p206_p3), %v1347_v1  ;;  %1222 = vmatprep.subr.bf16.mxu0 (!%p206_p3), %v1347_v1  ;;  %v750_v25 = vadd.s32 (!%p206_p3), 8, %v1492_v23  ;;  %v1496_v26 = vmul.u32.u64.low (!%p206_p3), 3817748708, %v1492_v23  ;;  %v1497_v27 = vmul.u32.u64.high 3817748708, %v1492_v23, %v1496_v26  ;;  %v751_v33 = vadd.s32 (!%p206_p3), 16, %v1492_v23 }
   0xb   : > { %v752_v35 = vadd.s32 (!%p206_p3), 24, %v1492_v23  ;;  %v753_v44 = vadd.s32 (!%p206_p3), 32, %v1492_v23  ;;  %v1525_v51 = vadd.s32 (!%p206_p3), 40, %v1492_v23  ;;  %v1539_v62 = vadd.s32 (!%p206_p3), 48, %v1492_v23 }
   0xc   : > { %v1501_v29 = vmul.u32.u64.low (!%p206_p3), 3817748708, %v750_v25  ;;  %v1502_v30 = vmul.u32.u64.high 3817748708, %v750_v25, %v1501_v29  ;;  %v1508_v36 = vmul.u32.u64.low (!%p206_p3), 3817748708, %v751_v33  ;;  %v1509_v37 = vmul.u32.u64.high 3817748708, %v751_v33, %v1508_v36 }
   0xd   : > { %v764_v38 = vshrl.u32 (!%p206_p3), %v1497_v27, 3  ;;  %v1515_v41 = vmul.u32.u64.low (!%p206_p3), 3817748708, %v752_v35  ;;  %v1516_v42 = vmul.u32.u64.high 3817748708, %v752_v35, %v1515_v41  ;;  %v1573_v27 = vadd.s32 (!%p206_p3), 64, %v1492_v23 }
   0xe   : > { %s1765_s15 = smov (!%p252_p4, %s1337_s15), 1  ;;  %v775_v40 = vshrl.u32 %v1502_v30, 3  ;;  %v1521_v49 = vmul.u32.u64.low 3817748708, %v753_v44  ;;  %v1522_v50 = vmul.u32.u64.high 3817748708, %v753_v44, %v1521_v49  ;;  %v786_v52 = vshrl.u32 %v1509_v37, 3 }
   0xf   : > { %s1264_s23 = smul.u32 36, %s1765_s15  ;;  %v765_v47 = vmul.u32 9, %v764_v38  ;;  %v797_v56 = vshrl.u32 %v1516_v42, 3  ;;  %v1535_v58 = vmul.u32.u64.low 3817748708, %v1525_v51  ;;  %v1536_v59 = vmul.u32.u64.high 3817748708, %v1525_v51, %v1535_v58  ;;  %s276_s10 = scalar_lea.vmem %s1732_s3, %s1765_s15 }
  0x10   : > { %v776_v48 = vmul.u32 9, %v775_v40  ;;  %v787_v61 = vmul.u32 9, %v786_v52  ;;  %v808_v2 = vshrl.u32 %v1522_v50, 3  ;;  %s282_s13 = scalar_lea.vmem %s1733_s4, %s1765_s15 }
  0x11   : > { %s269_s26 = scalar_lea.vmem %s1730_s1, %s1264_s23  ;;  %s1423_s7 = scalar_lea.vmem %s1729_s0, %s1264_s23  ;;  %v766_v53 = vsub.s32 %v1492_v23, %v765_v47  ;;  %v798_v0 = vmul.u32 9, %v797_v56  ;;  %v819_v19 = vshrl.u32 %v1536_v59, 3 }
  0x12   : > { %v1311_v5 = vld [vmem:[%s269_s26] sm:$0xff]   ;;  %v1314_v6 = vld [vmem:[%s269_s26 + $0x8] sm:$0xff]   ;;  %v1315_v7 = vld [vmem:[%s269_s26 + $0x10] sm:$0xff]   ;;  %v1531_v55 = vsub.s32 %v750_v25, %v776_v48  ;;  %v1589_v41 = vmul.u32.u64.low 3817748708, %v1573_v27  ;;  %v1590_v42 = vmul.u32.u64.high 3817748708, %v1573_v27, %v1589_v41 }
  0x13   : > { %1159 = vmatmul.mubr.msk.bf16.vlgmr.msra.gmra.mrb[0].mxu0 %vm339_vm1, %v1311_v5  ;;  %1181 = vmatmul.mubr.msk.bf16.vlgmr.msra.gmra.mrb[0].mxu1 %vm339_vm1, %v1311_v5  ;;  %v1316_v8 = vld [vmem:[%s269_s26 + $0x18] sm:$0xff]   ;;  %v1317_v9 = vld [vmem:[%s269_s26 + $0x20] ss:$0 sps:$4 sm:$0xff]   ;;  %v1319_v11 = vld [vmem:[%s1423_s7 + $0x8] sm:$0xff]   ;;  %vm857_vm2 = vcmp.ne.s32.totalorder %v766_v53, 0  ;;  %vm866_vm3 = vcmp.lt.s32.totalorder %v766_v53, 0  ;;  %v1549_v5 = vsub.s32 %v751_v33, %v787_v61 }
  0x14   : > { %1201 = vmatpush3.bf16.msra.mxu1 %v1312_v3  ;;  %1223 = vmatpush3.bf16.msra.mxu0 %v1313_v4  ;;  %v1318_v10 = vld [vmem:[%s1423_s7] sm:$0xff]   ;;  %v1320_v12 = vld [vmem:[%s1423_s7 + $0x10] sm:$0xff]   ;;  %v1321_v13 = vld [vmem:[%s1423_s7 + $0x18] sm:$0xff]   ;;  %vm858_vm4 = vcmp.ne.s32.totalorder %v1531_v55, 0  ;;  %vm867_vm5 = vcmp.lt.s32.totalorder %v1531_v55, 0  ;;  %v885_v4 = vadd.s32 9, %v1531_v55 }
  0x15   : > { %1162 = vmatprep.mubr.msk.bf16.mxu0 %vm1348_vm0, %v1347_v1  ;;  %1184 = vmatprep.mubr.msk.bf16.mxu1 %vm1348_vm0, %v1347_v1  ;;  %v1322_v14 = vld [vmem:[%s1423_s7 + $0x20] ss:$0 sps:$4 sm:$0xff]   ;;  %vm1544_vm6 = vmand %vm866_vm3, %vm857_vm2  ;;  %vm859_vm9 = vcmp.ne.s32.totalorder %v1549_v5, 0  ;;  %vm868_vm10 = vcmp.lt.s32.totalorder %v1549_v5, 0  ;;  %v820_v38 = vmul.u32 9, %v819_v19 }
  0x16   : > { %vm1555_vm7 = vmand %vm867_vm5, %vm858_vm4 }
  0x17   : > { %v894_v26 = vsel %vm1555_vm7, %v885_v4, %v1531_v55  ;;  %vm1594_vm13 = vmand %vm868_vm10, %vm859_vm9 }
  0x1b   : > { %1163 = vmatmul.mubr.msk.bf16.gmra.mrb[4].mxu0 %vm339_vm1, %v1314_v6  ;;  %1185 = vmatmul.mubr.msk.bf16.gmra.mrb[4].mxu1 %vm339_vm1, %v1314_v6 }
  0x1c   : > { %1166 = vmatprep.mubr.msk.bf16.mxu0 %vm1348_vm0, %v1347_v1  ;;  %1188 = vmatprep.mubr.msk.bf16.mxu1 %vm1348_vm0, %v1347_v1 }
  0x23   : > { %1167 = vmatmul.mubr.msk.bf16.gmra.mrb[8].mxu0 %vm339_vm1, %v1315_v7  ;;  %1189 = vmatmul.mubr.msk.bf16.gmra.mrb[8].mxu1 %vm339_vm1, %v1315_v7  ;;  %v1552_v6 = vmul.u32.u64.low 3817748708, %v1539_v62  ;;  %v1553_v7 = vmul.u32.u64.high 3817748708, %v1539_v62, %v1552_v6 }
  0x24   : > { %1170 = vmatprep.mubr.msk.bf16.mxu0 %vm1348_vm0, %v1347_v1  ;;  %1192 = vmatprep.mubr.msk.bf16.mxu1 %vm1348_vm0, %v1347_v1 }
  0x25   : > { %v830_v40 = vshrl.u32 %v1553_v7, 3 }
  0x27   : > { %v831_v61 = vmul.u32 9, %v830_v40 }
  0x2b   : > { %1171 = vmatmul.mubr.msk.bf16.gmra.mrb[12].mxu0 %vm339_vm1, %v1316_v8  ;;  %1193 = vmatmul.mubr.msk.bf16.gmra.mrb[12].mxu1 %vm339_vm1, %v1316_v8 }
  0x2c   : > { %1174 = vmatprep.mubr.msk.bf16.mxu0 %vm1348_vm0, %v1347_v1  ;;  %1196 = vmatprep.mubr.msk.bf16.mxu1 %vm1348_vm0, %v1347_v1 }
  0x33   : > { %1175 = vmatmul.mubr.msk.bf16.gmra.mrb[16].mxu0 %vm339_vm1, %v1317_v9  ;;  %1197 = vmatmul.mubr.msk.bf16.gmra.mrb[16].mxu1 %vm339_vm1, %v1317_v9 }
  0x34   : > { %1202 = vmatprep.mubr.msk.bf16.mxu1 %vm1348_vm0, %v1347_v1  ;;  %1224 = vmatprep.mubr.msk.bf16.mxu0 %vm1348_vm0, %v1347_v1 }
  0x3b   : > { %1203 = vmatmul.mubr.msk.bf16.vlgmr.msra.gmra.mrb[0].mxu1 %vm339_vm1, %v1318_v10  ;;  %1225 = vmatmul.mubr.msk.bf16.vlgmr.msra.gmra.mrb[20].mxu0 %vm339_vm1, %v1318_v10 }
  0x3c   : > { %1206 = vmatprep.mubr.msk.bf16.mxu1 %vm1348_vm0, %v1347_v1  ;;  %1228 = vmatprep.mubr.msk.bf16.mxu0 %vm1348_vm0, %v1347_v1 }
  0x43   : > { %1207 = vmatmul.mubr.msk.bf16.gmra.mrb[4].mxu1 %vm339_vm1, %v1319_v11  ;;  %1229 = vmatmul.mubr.msk.bf16.gmra.mrb[24].mxu0 %vm339_vm1, %v1319_v11  ;;  %v1559_v11 = vsub.s32 %v752_v35, %v798_v0 }
  0x44   : > { %1210 = vmatprep.mubr.msk.bf16.mxu1 %vm1348_vm0, %v1347_v1  ;;  %1232 = vmatprep.mubr.msk.bf16.mxu0 %vm1348_vm0, %v1347_v1 }
  0x45   : > { %vm860_vm11 = vcmp.ne.s32.totalorder %v1559_v11, 0  ;;  %vm869_vm12 = vcmp.lt.s32.totalorder %v1559_v11, 0 }
  0x46   : > { %vm1603_vm15 = vmand %vm869_vm12, %vm860_vm11 }
  0x4b   : > { %1211 = vmatmul.mubr.msk.bf16.gmra.mrb[8].mxu1 %vm339_vm1, %v1320_v12  ;;  %1233 = vmatmul.mubr.msk.bf16.gmra.mrb[28].mxu0 %vm339_vm1, %v1320_v12  ;;  %v1562_v12 = vadd.s32 56, %v1492_v23 }
  0x4c   : > { %1214 = vmatprep.mubr.msk.bf16.mxu1 %vm1348_vm0, %v1347_v1  ;;  %1236 = vmatprep.mubr.msk.bf16.mxu0 %vm1348_vm0, %v1347_v1 }
  0x4d   : > { %v1580_v35 = vmul.u32.u64.low 3817748708, %v1562_v12  ;;  %v1581_v36 = vmul.u32.u64.high 3817748708, %v1562_v12, %v1580_v35 }
  0x4f   : > { %v841_v6 = vshrl.u32 %v1581_v36, 3 }
  0x53   : > { %1215 = vmatmul.mubr.msk.bf16.gmra.mrb[12].mxu1 %vm339_vm1, %v1321_v13  ;;  %1237 = vmatmul.mubr.msk.bf16.gmra.mrb[32].mxu0 %vm339_vm1, %v1321_v13 }
  0x54   : > { %1218 = vmatprep.mubr.msk.bf16.mxu1 %vm1348_vm0, %v1347_v1  ;;  %1240 = vmatprep.mubr.msk.bf16.mxu0 %vm1348_vm0, %v1347_v1  ;;  %v884_v1 = vadd.s32 9, %v766_v53  ;;  %vm1607_vm0 = vcmp.ne.s32.totalorder %v894_v26, 8 }
  0x5b   : > { %1219 = vmatmul.mubr.msk.bf16.gmra.mrb[16].mxu1 %vm339_vm1, %v1322_v14  ;;  %1241 = vmatmul.mubr.msk.bf16.gmra.mrb[36].mxu0 %vm339_vm1, %v1322_v14 }
  0xe6   : > { %v1484_v15 = vpop.f32.mrb[0].mxu0 }
  0xe7   : > { %v1160_v16 = vpop.f32.mrb[1].mxu0 }
  0xe8   : > { %v1486_v17 = vpop.f32.mrb[2].mxu0 }
  0xe9   : > { %v1161_v18 = vpop.f32.mrb[3].mxu0 }
  0xea   : > { %v809_v18 = vmul.u32 9, %v808_v2 }
  0xec   : > { %v1585_v23 = vsub.s32 %v753_v44, %v809_v18 }
  0xee   : > { %v1488_v20 = vpop.f32.mrb[4].mxu0  ;;  %vm861_vm1 = vcmp.ne.s32.totalorder %v1585_v23, 0  ;;  %vm870_vm2 = vcmp.lt.s32.totalorder %v1585_v23, 0 }
  0xef   : > { %v1164_v21 = vpop.f32.mrb[5].mxu0  ;;  %vm1634_vm4 = vmand %vm870_vm2, %vm861_vm1 }
  0xf0   : > { %v1490_v22 = vpop.f32.mrb[6].mxu0 }
  0xf1   : > { %v1165_v24 = vpop.f32.mrb[7].mxu0 }
  0xf2   : > { %v893_v24 = vsel %vm1544_vm6, %v884_v1, %v766_v53 }
  0xf3   : > { %vm1599_vm14 = vcmp.ne.s32.totalorder %v893_v24, 8 }
  0xf6   : > { %v1499_v28 = vpop.f32.mrb[8].mxu0 }
  0xf7   : > { %v1168_v31 = vpop.f32.mrb[9].mxu0 }
  0xf8   : > { %v1504_v32 = vpop.f32.mrb[10].mxu0 }
  0xf9   : > { %v1169_v34 = vpop.f32.mrb[11].mxu0 }
  0xfa   : > { %v886_v34 = vadd.s32 9, %v1549_v5 }
  0xfc   : > { %v895_v59 = vsel %vm1594_vm13, %v886_v34, %v1549_v5  ;;  %v888_v5 = vadd.s32 9, %v1585_v23 }
  0xfd   : > { %vm904_vm3 = vcmp.ne.s32.totalorder %v895_v59, 8 }
  0xfe   : > { %v1512_v39 = vpop.f32.mrb[12].mxu0 }
  0xff   : > { %v1172_v43 = vpop.f32.mrb[13].mxu0 }
 0x100   : > { %v1519_v45 = vpop.f32.mrb[14].mxu0 }
 0x101   : > { %v1173_v46 = vpop.f32.mrb[15].mxu0 }
 0x102   : > { %v887_v46 = vadd.s32 9, %v1559_v11 }
 0x106   : > { %v1529_v54 = vpop.f32.mrb[16].mxu0 }
 0x107   : > { %v1176_v57 = vpop.f32.mrb[17].mxu0 }
 0x108   : > { %v424_v60 = vpop.f32.mrb[18].mxu0  ;;  %v1613_v57 = vsub.s32 %v1525_v51, %v820_v38  ;;  %v896_v51 = vsel %vm1603_vm15, %v887_v46, %v1559_v11  ;;  %v852_v11 = vshrl.u32 %v1590_v42, 3 }
 0x109   : > { %v1177_v63 = vpop.f32.mrb[19].mxu0  ;;  %vm1646_vm7 = vcmp.ne.s32.totalorder %v896_v51, 8 }
 0x10a   : > { %vm862_vm5 = vcmp.ne.s32.totalorder %v1613_v57, 0  ;;  %vm871_vm6 = vcmp.lt.s32.totalorder %v1613_v57, 0  ;;  %v889_v26 = vadd.s32 9, %v1613_v57  ;;  %v853_v38 = vmul.u32 9, %v852_v11 }
 0x10b   : > { %vm1658_vm9 = vmand %vm871_vm6, %vm862_vm5 }
 0x10e   : > { %v586_v9 = vpop.f32.mrb[0].mxu1  ;;  %v701_v10 = vpop.f32.mrb[20].mxu0 }
 0x10f   : > { %v702_v13 = vadd.f32 %v701_v10, %v1484_v15  ;;  %v1204_v14 = vpop.f32.mrb[1].mxu1  ;;  %v1226_v16 = vpop.f32.mrb[21].mxu0  ;;  %v634_v15 = vrot.slane %v586_v9, 1  ;;  %v1643_v10 = vsub.s32 %v1539_v62, %v831_v61  ;;  %v842_v62 = vmul.u32 9, %v841_v6 }
 0x110   : > { %v589_v21 = vpop.f32.mrb[2].mxu1  ;;  %v704_v25 = vpop.f32.mrb[22].mxu0 }
 0x111   : > { %v635_v29 = vrot.slane %v589_v21, 1  ;;  %v705_v30 = vadd.f32 %v704_v25, %v1486_v17  ;;  %v1205_v31 = vpop.f32.mrb[3].mxu1  ;;  %v1227_v33 = vpop.f32.mrb[23].mxu0  ;;  %v897_v25 = vsel %vm1634_vm4, %v888_v5, %v1585_v23  ;;  %vm863_vm10 = vcmp.ne.s32.totalorder %v1643_v10, 0 }
 0x112   : > { %vm872_vm11 = vcmp.lt.s32.totalorder %v1643_v10, 0  ;;  %vm906_vm12 = vcmp.ne.s32.totalorder %v897_v25, 8 }
 0x113   : > { %v636_v37 = vsel %vm633_vm8, %v634_v15, %v635_v29  ;;  %vm1675_vm13 = vmand %vm872_vm11, %vm863_vm10 }
 0x114   : > { %v739_v17 = vadd.f32 %v702_v13, %v636_v37 }
 0x116   : > { %v594_v44 = vpop.f32.mrb[4].mxu1  ;;  %v709_v48 = vpop.f32.mrb[24].mxu0  ;;  %v911_v3 = vsel %vm1599_vm14, %v739_v17, 0.0 }
 0x117   : > { %v637_v50 = vrot.slane %v594_v44, 1  ;;  %v710_v53 = vadd.f32 %v709_v48, %v1488_v20  ;;  %v1208_v55 = vpop.f32.mrb[5].mxu1  ;;  %v1230_v56 = vpop.f32.mrb[25].mxu0  ;;  %v935_v13 = vmul.f32 %v911_v3, %v911_v3  ;;  %v890_v44 = vadd.s32 9, %v1643_v10 }
 0x118   : > { %v597_v58 = vpop.f32.mrb[6].mxu1  ;;  %v712_v60 = vpop.f32.mrb[26].mxu0  ;;  %v843_v48 = vsub.s32 %v1562_v12, %v842_v62 }
 0x119   : > { %v638_v63 = vsel %vm633_vm8, %v635_v29, %v637_v50  ;;  %v639_v0 = vrot.slane %v597_v58, 1  ;;  %v713_v20 = vadd.f32 %v712_v60, %v1490_v22  ;;  %v1209_v1 = vpop.f32.mrb[7].mxu1  ;;  %v1231_v2 = vpop.f32.mrb[27].mxu0  ;;  %v899_v60 = vsel %vm1675_vm13, %v890_v44, %v1643_v10 }
 0x11a   : > { %v740_v4 = vadd.f32 %v705_v30, %v638_v63  ;;  %vm864_vm15 = vcmp.ne.s32.totalorder %v843_v48, 0  ;;  %vm908_vm4 = vcmp.ne.s32.totalorder %v899_v60, 8 }
 0x11b   : > { %v640_v7 = vsel %vm633_vm8, %v637_v50, %v639_v0 }
 0x11c   : > { %v912_v8 = vsel %vm1607_vm0, %v740_v4, 0.0  ;;  %v741_v9 = vadd.f32 %v710_v53, %v640_v7  ;;  %v854_v53 = vsub.s32 %v1573_v27, %v853_v38  ;;  %vm873_vm0 = vcmp.lt.s32.totalorder %v843_v48, 0 }
 0x11d   : > { %v920_v14 = vadd.f32 %v912_v8, %v911_v3  ;;  %v936_v16 = vmul.f32 %v912_v8, %v912_v8  ;;  %v891_v4 = vadd.s32 9, %v843_v48 }
 0x11e   : > { %v913_v19 = vsel %vm904_vm3, %v741_v9, 0.0  ;;  %v602_v21 = vpop.f32.mrb[8].mxu1  ;;  %v717_v24 = vpop.f32.mrb[28].mxu0  ;;  %vm865_vm1 = vcmp.ne.s32.totalorder %v854_v53, 0  ;;  %vm874_vm2 = vcmp.lt.s32.totalorder %v854_v53, 0  ;;  %vm1694_vm3 = vmand %vm873_vm0, %vm864_vm15 }
 0x11f   : > { %v944_v15 = vadd.f32 %v936_v16, %v935_v13  ;;  %v921_v29 = vadd.f32 %v920_v14, %v913_v19  ;;  %v937_v30 = vmul.f32 %v913_v19, %v913_v19  ;;  %v641_v31 = vrot.slane %v602_v21, 1  ;;  %v1212_v33 = vpop.f32.mrb[9].mxu1  ;;  %v1234_v34 = vpop.f32.mrb[29].mxu0  ;;  %vm1699_vm5 = vmand %vm874_vm2, %vm865_vm1 }
 0x120   : > { %v718_v36 = vadd.f32 %v717_v24, %v1499_v28  ;;  %v605_v37 = vpop.f32.mrb[10].mxu1  ;;  %v720_v23 = vpop.f32.mrb[30].mxu0  ;;  %v898_v28 = vsel %vm1658_vm9, %v889_v26, %v1613_v57  ;;  %v900_v21 = vsel %vm1694_vm3, %v891_v4, %v843_v48 }
 0x121   : > { %v945_v17 = vadd.f32 %v944_v15, %v937_v30  ;;  %v642_v40 = vsel %vm633_vm8, %v639_v0, %v641_v31  ;;  %v643_v41 = vrot.slane %v605_v37, 1  ;;  %v721_v42 = vadd.f32 %v720_v23, %v1504_v32  ;;  %v1213_v43 = vpop.f32.mrb[11].mxu1  ;;  %v1235_v46 = vpop.f32.mrb[31].mxu0 }
 0x122   : > { %v742_v47 = vadd.f32 %v713_v20, %v642_v40  ;;  %vm1682_vm14 = vcmp.ne.s32.totalorder %v898_v28, 8  ;;  %vm909_vm6 = vcmp.ne.s32.totalorder %v900_v21, 8 }
 0x123   : > { %v644_v49 = vsel %vm633_vm8, %v641_v31, %v643_v41 }
 0x124   : > { %v914_v32 = vsel %vm1646_vm7, %v742_v47, 0.0  ;;  %v743_v52 = vadd.f32 %v718_v36, %v644_v49 }
 0x125   : > { %v922_v55 = vadd.f32 %v921_v29, %v914_v32  ;;  %v938_v56 = vmul.f32 %v914_v32, %v914_v32 }
 0x126   : > { %v915_v12 = vsel %vm906_vm12, %v743_v52, 0.0  ;;  %v610_v58 = vpop.f32.mrb[12].mxu1  ;;  %v725_v59 = vpop.f32.mrb[32].mxu0 }
 0x127   : > { %v946_v61 = vadd.f32 %v945_v17, %v938_v56  ;;  %v923_v63 = vadd.f32 %v922_v55, %v915_v12  ;;  %v939_v0 = vmul.f32 %v915_v12, %v915_v12  ;;  %v645_v20 = vrot.slane %v610_v58, 1  ;;  %v1216_v27 = vpop.f32.mrb[13].mxu1  ;;  %v1238_v1 = vpop.f32.mrb[33].mxu0 }
 0x128   : > { %v726_v2 = vadd.f32 %v725_v59, %v1512_v39  ;;  %v613_v51 = vpop.f32.mrb[14].mxu1  ;;  %v728_v3 = vpop.f32.mrb[34].mxu0  ;;  %v892_v39 = vadd.s32 9, %v854_v53 }
 0x129   : > { %v947_v5 = vadd.f32 %v946_v61, %v939_v0  ;;  %v646_v6 = vsel %vm633_vm8, %v643_v41, %v645_v20  ;;  %v647_v7 = vrot.slane %v613_v51, 1  ;;  %v729_v22 = vadd.f32 %v728_v3, %v1519_v45  ;;  %v1217_v8 = vpop.f32.mrb[15].mxu1  ;;  %v1239_v9 = vpop.f32.mrb[35].mxu0 }
 0x12a   : > { %v744_v10 = vadd.f32 %v721_v42, %v646_v6  ;;  %v901_v62 = vsel %vm1699_vm5, %v892_v39, %v854_v53 }
 0x12b   : > { %v648_v13 = vsel %vm633_vm8, %v645_v20, %v647_v7  ;;  %vm910_vm7 = vcmp.ne.s32.totalorder %v901_v62, 8 }
 0x12c   : > { %v916_v45 = vsel %vm1682_vm14, %v744_v10, 0.0  ;;  %v745_v16 = vadd.f32 %v726_v2, %v648_v13 }
 0x12d   : > { %v924_v18 = vadd.f32 %v923_v63, %v916_v45  ;;  %v940_v19 = vmul.f32 %v916_v45, %v916_v45 }
 0x12e   : > { %v917_v24 = vsel %vm908_vm4, %v745_v16, 0.0  ;;  %v618_v25 = vpop.f32.mrb[16].mxu1  ;;  %v733_v26 = vpop.f32.mrb[36].mxu0 }
 0x12f   : > { %v948_v15 = vadd.f32 %v947_v5, %v940_v19  ;;  %v925_v29 = vadd.f32 %v924_v18, %v917_v24  ;;  %v941_v30 = vmul.f32 %v917_v24, %v917_v24  ;;  %v649_v31 = vrot.slane %v618_v25, 1  ;;  %v1220_v33 = vpop.f32.mrb[17].mxu1  ;;  %v1242_v34 = vpop.f32.mrb[37].mxu0 }
 0x130   : > { %v734_v35 = vadd.f32 %v733_v26, %v1529_v54  ;;  %v621_v36 = vpop.f32.mrb[18].mxu1  ;;  %v736_v37 = vpop.f32.mrb[38].mxu0 }
 0x131   : > { %v949_v23 = vadd.f32 %v948_v15, %v941_v30  ;;  %v650_v38 = vsel %vm633_vm8, %v647_v7, %v649_v31  ;;  %v660_v17 = vsel %vm633_vm8, %v649_v31, 0.0  ;;  %v1221_v40 = vpop.f32.mrb[19].mxu1  ;;  %v1243_v41 = vpop.f32.mrb[39].mxu0 }
 0x132   : > { %v746_v42 = vadd.f32 %v729_v22, %v650_v38  ;;  %v747_v43 = vadd.f32 %v734_v35, %v660_v17 }
 0x134   : > { %v918_v46 = vsel %vm909_vm6, %v746_v42, 0.0  ;;  %v919_v47 = vsel %vm910_vm7, %v747_v43, 0.0 }
 0x135   : > { %v942_v28 = vmul.f32 %v918_v46, %v918_v46  ;;  %v926_v44 = vadd.f32 %v925_v29, %v918_v46  ;;  %v943_v54 = vmul.f32 %v919_v47, %v919_v47 }
 0x137   : > { %v927_v48 = vadd.f32 %v926_v44, %v919_v47  ;;  %v950_v49 = vadd.f32 %v949_v23, %v942_v28 }
 0x139   : > { %v928_v50 = vrot.slane %v927_v48, 4  ;;  %v951_v32 = vadd.f32 %v950_v49, %v943_v54 }
 0x13b   : > { %v929_v52 = vadd.f32 %v928_v50, %v927_v48  ;;  %v952_v53 = vrot.slane %v951_v32, 4 }
 0x13d   : > { %v930_v55 = vrot.slane %v929_v52, 2  ;;  %v953_v56 = vadd.f32 %v952_v53, %v951_v32 }
 0x13f   : > { %v931_v57 = vadd.f32 %v930_v55, %v929_v52  ;;  %v954_v12 = vrot.slane %v953_v56, 2 }
 0x141   : > { %v932_v58 = vrot.slane %v931_v57, 1  ;;  %v955_v59 = vadd.f32 %v954_v12, %v953_v56 }
 0x143   : > { %v933_v60 = vadd.f32 %v932_v58, %v931_v57  ;;  %v956_v61 = vrot.slane %v955_v59, 1 }
 0x145   : > { %934 = vst [vmem:[%s276_s10] sm:$0x1] %v933_v60  ;;  %v957_v63 = vadd.f32 %v956_v61, %v955_v59 }
 0x147   : > { %958 = vst [vmem:[%s282_s13] sm:$0x1] %v957_v63 }
 0x148 PF: > { %s15_s17 = sadd.s32 1, %s1345_s17   ;;  %s1760_s15 = smov %s1341_s16 }
 0x149   : > { %p12_p5 = scmp.ge.s32.totalorder %s15_s17, 4   ;;  %s1761_s16 = smov %s1763_s18 }
 0x14b   :  { %14 = sbr.rel (!%p12_p5) target bundleno = 2 (0x2), region = 80 }

</bundles_post_ra>
